<compile_context>
chip_gen: v5e
topology: v5e:2x2
jax: 0.10.0
libtpu: 0.0.40
codegen_flags: <defaults>
</compile_context>

<pallas_src>
import functools

import jax
import jax.numpy as jnp
import numpy as np
from jax import lax
from jax.experimental import pallas as pl
from jax.experimental.pallas import tpu as pltpu

NEG_INF = -9e15  # same masking constant used by the reference GAT implementation


def _leaky_relu(x, alpha):
    return jnp.where(x > 0, x, alpha * x)


def _elu(x):
    return jnp.where(x > 0, x, jnp.exp(x) - 1.0)


# ------------------------------- VMEM budgeting ----------------------------------------
def _vmem_capacity_bytes():
    try:
        return int(pltpu.get_tpu_info().vmem_capacity_bytes)
    except Exception:
        return 64 * 1024 * 1024  # conservative fallback (v7x per-TC VMEM)


def _attention_vmem_bytes(tm, n, hd, nheads):
    """Rough per-step VMEM estimate for the attention pallas_call at row tile tm."""
    adj_tiles = 2 * tm * n * 1              # int8 adj mask, double-buffered
    adjad_tiles = 2 * tm * n * 4            # f32 adj_ad, double-buffered
    f1_tiles = 2 * tm * nheads * 4
    out_tiles = 2 * tm * hd * 4
    resident = n * hd * 4 + nheads * n * 4  # Wh_all + f2^T (single-buffered, grid-invariant)
    scratch = tm * n * 4                    # shared per-head p/att scratch
    live_tmp = 2 * tm * n * 4               # e + assorted live (tm, N) temporaries (conservative)
    return adj_tiles + adjad_tiles + f1_tiles + out_tiles + resident + scratch + live_tmp


def _pick_row_tile(n, hd, nheads, budget_bytes, max_tile=512):
    """Largest row tile dividing n that respects int8 sublane tiling (32) and the budget."""
    candidates = []
    if n <= max_tile:
        candidates.append(n)
    t = min(max_tile, n)
    t -= t % 32
    while t >= 32:
        if n % t == 0 and t != n:
            candidates.append(t)
        t -= 32
    if not candidates:
        return n
    for tm in candidates:  # descending
        if _attention_vmem_bytes(tm, n, hd, nheads) <= budget_bytes:
            return tm
    return candidates[-1]


def _spec_maker(single_buffer_invariant):
    """Returns a BlockSpec factory for grid-invariant (constant index_map) operands."""
    if single_buffer_invariant:
        return lambda shape, index_map: pl.BlockSpec(
            shape, index_map, pipeline_mode=pl.Buffered(1))
    return lambda shape, index_map: pl.BlockSpec(shape, index_map)


# --------------------------------------------------------------------------------------
# Stage 1: batched projection for all heads + fused attention-vector products.
def project_kernel(x_ref, w_ref, a1_ref, a2t_ref, wh_ref, f1_ref, f2t_ref):
    wh = jnp.dot(x_ref[...], w_ref[...], preferred_element_type=jnp.float32)    # (tm, HD)
    wh_ref[...] = wh
    f1_ref[...] = jnp.dot(wh, a1_ref[...], preferred_element_type=jnp.float32)  # (tm, ncols)
    # f2^T produced directly as (ncols, tm): contract the HD axis of both operands
    # (q @ k^T pattern) so no sublane<->lane transpose is ever needed downstream.
    f2t_ref[...] = lax.dot_general(
        a2t_ref[...], wh, (((1,), (1,)), ((), ())),
        preferred_element_type=jnp.float32)                                      # (ncols, tm)


def _project(x, w_all, a1, a2t, *, tm, vmem_limit, single_buffer_invariant):
    n, f = x.shape
    hd = w_all.shape[1]
    ncols = a1.shape[1]
    inv_spec = _spec_maker(single_buffer_invariant)
    return pl.pallas_call(
        project_kernel,
        grid=(n // tm,),
        out_shape=(
            jax.ShapeDtypeStruct((n, hd), jnp.float32),     # Wh_all
            jax.ShapeDtypeStruct((n, ncols), jnp.float32),  # f1 per head
            jax.ShapeDtypeStruct((ncols, n), jnp.float32),  # f2^T per head
        ),
        in_specs=[
            pl.BlockSpec((tm, f), lambda i: (i, 0)),        # x row tile
            inv_spec((f, hd), lambda i: (0, 0)),            # W_all (resident, single-buffered)
            inv_spec((hd, ncols), lambda i: (0, 0)),        # A1 block-diag (resident)
            inv_spec((ncols, hd), lambda i: (0, 0)),        # A2^T block-diag (resident)
        ],
        out_specs=(
            pl.BlockSpec((tm, hd), lambda i: (i, 0)),
            pl.BlockSpec((tm, ncols), lambda i: (i, 0)),
            pl.BlockSpec((ncols, tm), lambda i: (0, i)),
        ),
        compiler_params=pltpu.CompilerParams(
            dimension_semantics=("parallel",),
            vmem_limit_bytes=vmem_limit),
    )(x, w_all, a1, a2t)


# --------------------------------------------------------------------------------------
# Stage 2: row-tiled masked attention; heads looped inside -> adj/adj_ad tile reuse.
def attention_kernel(adj_ref, adjad_ref, wh_ref, f1_ref, f2t_ref, out_ref, p_scratch, *,
                     alpha, nheads, nhid, output_layer):
    mask = adj_ref[...] > 0            # (tm, N)  int8 mask stream, shared across heads
    adj_ad = adjad_ref[...]            # (tm, N)  f32, shared across heads

    def head_out(h):
        f1 = f1_ref[:, h:h + 1]        # (tm, 1)
        f2 = f2t_ref[h:h + 1, :]       # (1, N)   already transposed -> no in-kernel .T
        e = jnp.where(mask, _leaky_relu(f1 + f2, alpha), NEG_INF)
        # One shared (tm, N) VMEM scratch holds the big per-head temporaries (p, att) so the
        # statically unrolled head loop does not keep nheads copies live simultaneously.
        p_scratch[...] = jnp.exp(e - jnp.max(e, axis=1, keepdims=True))
        # Row-sum reciprocal on the EUP; fold the adj_ad reweighting into the same pass.
        inv = pl.reciprocal(jnp.sum(p_scratch[...], axis=1, keepdims=True), approx=False)
        p_scratch[...] = p_scratch[...] * (adj_ad * inv)          # softmax * adj_ad
        wh_h = wh_ref[:, h * nhid:(h + 1) * nhid]                 # (N, nhid)
        return jnp.dot(p_scratch[...], wh_h, preferred_element_type=jnp.float32)  # (tm, nhid)

    if output_layer:
        y = _elu(head_out(0))                            # concat=False; F.elu in forward()
        y = y - jnp.max(y, axis=1, keepdims=True)        # log_softmax(dim=1)
        out_ref[...] = y - jnp.log(jnp.sum(jnp.exp(y), axis=1, keepdims=True))
    else:
        # torch.cat(dim=1): build the full (tm, nheads*nhid) tile in registers and do ONE
        # lane-dense store instead of nheads narrow (nhid-lane) masked column stores.
        head_outs = [_elu(head_out(h)) for h in range(nheads)]    # concat=True -> elu
        out_ref[...] = head_outs[0] if nheads == 1 else jnp.concatenate(head_outs, axis=1)


def _attention(adj_mask_i8, adj_ad, wh, f1, f2t, *, alpha, nheads, nhid, output_layer,
               tm, vmem_limit, single_buffer_invariant):
    n = adj_mask_i8.shape[0]
    hd = wh.shape[1]
    inv_spec = _spec_maker(single_buffer_invariant)
    kernel = functools.partial(attention_kernel, alpha=alpha, nheads=nheads,
                               nhid=nhid, output_layer=output_layer)
    return pl.pallas_call(
        kernel,
        grid=(n // tm,),
        out_shape=jax.ShapeDtypeStruct((n, hd), jnp.float32),
        in_specs=[
            pl.BlockSpec((tm, n), lambda i: (i, 0)),        # adj mask (int8) row tile
            pl.BlockSpec((tm, n), lambda i: (i, 0)),        # adj_ad (f32) row tile
            inv_spec((n, hd), lambda i: (0, 0)),            # Wh_all (resident, single-buffered)
            pl.BlockSpec((tm, nheads), lambda i: (i, 0)),   # f1 row tile
            inv_spec((nheads, n), lambda i: (0, 0)),        # f2^T (resident, single-buffered)
        ],
        out_specs=pl.BlockSpec((tm, hd), lambda i: (i, 0)),
        scratch_shapes=[pltpu.VMEM((tm, n), jnp.float32)],  # shared per-head p/att scratch
        compiler_params=pltpu.CompilerParams(
            dimension_semantics=("parallel",),
            vmem_limit_bytes=vmem_limit),
    )(adj_mask_i8, adj_ad, wh, f1, f2t)


# --------------------------------------------------------------------------------------
def rwr_process_forward(x, adj, adj_ad, w_heads, a_heads, w_out, a_out, *,
                        alpha, row_tile=None, single_buffer_invariant=True):
    n, nfeat = x.shape
    nheads, _, nhid = w_heads.shape
    hd = nheads * nhid
    nclass = w_out.shape[1]

    # Explicit scoped-VMEM limit (default is only 16 MiB on v5e / 32 MiB on v6e & v7x).
    # Budget per-TC: on v7x the "parallel" row-tile axis is sharded across 2 TCs and the
    # resident Wh/f2t blocks are replicated into each TC's 64 MiB VMEM.
    capacity = _vmem_capacity_bytes()
    vmem_limit = min(int(capacity * 0.75), 100 * 1024 * 1024)
    budget = int(vmem_limit * 0.85)
    tm = (_pick_row_tile(n, max(hd, nclass), max(nheads, 1), budget)
          if row_tile is None else row_tile)

    x = x.astype(jnp.float32)
    adj_mask = (adj > 0).astype(jnp.int8)       # adj is only ever used as a > 0 mask
    adj_ad = adj_ad.astype(jnp.float32)

    # ---- fold per-head parameters into batched operands (tiny, parameter-side) ----
    w_all = jnp.transpose(w_heads, (1, 0, 2)).reshape(nfeat, hd)         # (F, nheads*nhid)
    a1_blk = a_heads[:, 0, :nhid]                                        # (nheads, nhid)
    a2_blk = a_heads[:, 0, nhid:]                                        # (nheads, nhid)
    eye = jnp.eye(nheads, dtype=jnp.float32)
    a1_bd = (a1_blk[:, :, None] * eye[:, None, :]).reshape(hd, nheads)     # block-diag (HD, nheads)
    a2t_bd = (eye[:, :, None] * a2_blk[None, :, :]).reshape(nheads, hd)    # block-diag^T (nheads, HD)

    # F.dropout(training=False) is the identity -> eval-mode forward.
    wh_all, f1_all, f2t_all = _project(
        x, w_all, a1_bd, a2t_bd, tm=tm, vmem_limit=vmem_limit,
        single_buffer_invariant=single_buffer_invariant)
    h = _attention(adj_mask, adj_ad, wh_all, f1_all, f2t_all, alpha=alpha,
                   nheads=nheads, nhid=nhid, output_layer=False, tm=tm,
                   vmem_limit=vmem_limit, single_buffer_invariant=single_buffer_invariant)

    # ---- output attention layer (+ F.elu + log_softmax fused into the kernel) ----
    a1_o = a_out[:, :nclass].T.astype(jnp.float32)                       # (C, 1)
    a2t_o = a_out[:, nclass:].astype(jnp.float32)                        # (1, C)
    wh_o, f1_o, f2t_o = _project(
        h, w_out.astype(jnp.float32), a1_o, a2t_o, tm=tm, vmem_limit=vmem_limit,
        single_buffer_invariant=single_buffer_invariant)
    out = _attention(adj_mask, adj_ad, wh_o, f1_o, f2t_o, alpha=alpha,
                     nheads=1, nhid=nclass, output_layer=True, tm=tm,
                     vmem_limit=vmem_limit, single_buffer_invariant=single_buffer_invariant)
    return out


# ---------------------------------- pure-JAX reference ---------------------------------
def _ref_layer(x, adj, adj_ad, w, a, alpha, concat):
    nh = w.shape[1]
    wh = x @ w
    e = _leaky_relu(wh @ a[:, :nh].T + (wh @ a[:, nh:].T).T, alpha)
    e = jnp.where(adj > 0, e, NEG_INF)
    att = jax.nn.softmax(e, axis=1) * adj_ad
    hp = att @ wh
    return _elu(hp) if concat else hp


def _ref_forward(x, adj, adj_ad, w_heads, a_heads, w_out, a_out, alpha):
    heads = [_ref_layer(x, adj, adj_ad, w_heads[h], a_heads[h], alpha, True)
             for h in range(w_heads.shape[0])]
    h = jnp.concatenate(heads, axis=1)
    y = _elu(_ref_layer(h, adj, adj_ad, w_out, a_out, alpha, False))
    return jax.nn.log_softmax(y, axis=1)


if __name__ == "__main__":
    # Small shapes consistent with the module: N nodes, nfeat features.
    N, NFEAT, NHID, NCLASS, NHEADS = 8, 16, 8, 4, 2
    ALPHA = 0.2   # leakyrelu negative slope; dropout only matters in training mode.

    key = jax.random.PRNGKey(0)
    kx, kadj, kw, ka, kwo, kao = jax.random.split(key, 6)

    x = jax.random.normal(kx, (N, NFEAT), dtype=jnp.float32)

    # Symmetric binary adjacency with self-loops.
    raw = jax.random.uniform(kadj, (N, N))
    adj = ((raw + raw.T) * 0.5 > 0.55).astype(jnp.float32) + jnp.eye(N, dtype=jnp.float32)
    adj = jnp.clip(adj, 0.0, 1.0)
    # RWR-style reweighting matrix: row-normalized adjacency.
    adj_ad = adj / jnp.sum(adj, axis=1, keepdims=True)

    # Deterministic xavier-uniform parameter init (shapes from RWRLayer/GAT).
    def xavier(k, shape):
        fan_in, fan_out = shape[-2], shape[-1]
        bound = float(np.sqrt(6.0 / (fan_in + fan_out)))
        return jax.random.uniform(k, shape, jnp.float32, -bound, bound)

    w_heads = xavier(kw, (NHEADS, NFEAT, NHID))          # per-head W
    a_heads = xavier(ka, (NHEADS, 1, 2 * NHID))          # per-head attention vector
    w_out = xavier(kwo, (NHEADS * NHID, NCLASS))         # out_att W
    a_out = xavier(kao, (1, 2 * NCLASS))                 # out_att attention vector

    args = (x, adj, adj_ad, w_heads, a_heads, w_out, a_out)
    try:
        out = jax.block_until_ready(
            rwr_process_forward(*args, alpha=ALPHA, single_buffer_invariant=True))
    except Exception:
        # Fallback for JAX versions that reject pipeline_mode=pl.Buffered(1) on
        # grid-invariant operands; everything else (int8 adj, lane-dense store,
        # scratch reuse, vmem_limit, budgeted tiles) is unchanged.
        out = jax.block_until_ready(
            rwr_process_forward(*args, alpha=ALPHA, single_buffer_invariant=False))

    ref = _ref_forward(x, adj, adj_ad, w_heads, a_heads, w_out, a_out, ALPHA)
    np.testing.assert_allclose(np.asarray(out), np.asarray(ref), rtol=1e-4, atol=1e-4)

    print("KERNEL_OK")
</pallas_src>

<mosaic_0001>
module attributes {stable_mosaic.version = 11 : i64} {
  func.func @project_kernel(%arg0: i32, %arg1: memref<8x16xf32, #tpu.memory_space<vmem>>, %arg2: memref<16x16xf32, #tpu.memory_space<vmem>>, %arg3: memref<16x2xf32, #tpu.memory_space<vmem>>, %arg4: memref<2x16xf32, #tpu.memory_space<vmem>>, %arg5: memref<8x16xf32, #tpu.memory_space<vmem>>, %arg6: memref<8x2xf32, #tpu.memory_space<vmem>>, %arg7: memref<2x8xf32, #tpu.memory_space<vmem>>) attributes {dimension_semantics = [#tpu.dimension_semantics<parallel>], iteration_bounds = array<i64: 1>, scalar_prefetch = 0 : i64, scratch_operands = 0 : i64, tpu.core_type = #tpu.core_type<tc>, window_params = [{transform_indices = @transform_0, window_bounds = array<i64: 8, 16>}, {pipeline_mode = #tpu.pipeline_mode<synchronous>, transform_indices = @transform_1, window_bounds = array<i64: 16, 16>}, {pipeline_mode = #tpu.pipeline_mode<synchronous>, transform_indices = @transform_2, window_bounds = array<i64: 16, 2>}, {pipeline_mode = #tpu.pipeline_mode<synchronous>, transform_indices = @transform_3, window_bounds = array<i64: 2, 16>}, {transform_indices = @transform_4, window_bounds = array<i64: 8, 16>}, {transform_indices = @transform_5, window_bounds = array<i64: 8, 2>}, {transform_indices = @transform_6, window_bounds = array<i64: 2, 8>}]} {
    %c0 = arith.constant 0 : index
    %c0_0 = arith.constant 0 : index
    %0 = vector.load %arg1[%c0, %c0_0] : memref<8x16xf32, #tpu.memory_space<vmem>>, vector<8x16xf32>
    %c0_1 = arith.constant 0 : index
    %c0_2 = arith.constant 0 : index
    %1 = vector.load %arg2[%c0_1, %c0_2] : memref<16x16xf32, #tpu.memory_space<vmem>>, vector<16x16xf32>
    %cst = arith.constant dense<0.000000e+00> : vector<8x16xf32>
    %2 = tpu.matmul %0, %1, %cst {dimension_numbers = #tpu.dot_dimension_numbers<[1], [0], [0], [1], [0, 0, 1, 1], [], []>} : vector<8x16xf32>, vector<16x16xf32>, vector<8x16xf32> -> vector<8x16xf32>
    %c0_3 = arith.constant 0 : index
    %c0_4 = arith.constant 0 : index
    %3 = vector.load %arg5[%c0_3, %c0_4] : memref<8x16xf32, #tpu.memory_space<vmem>>, vector<8x16xf32>
    tpu.vector_store %arg5[%c0_3, %c0_4], %2 {strides = array<i32>} : memref<8x16xf32, #tpu.memory_space<vmem>>, vector<8x16xf32>,
    %c0_5 = arith.constant 0 : index
    %c0_6 = arith.constant 0 : index
    %4 = vector.load %arg3[%c0_5, %c0_6] : memref<16x2xf32, #tpu.memory_space<vmem>>, vector<16x2xf32>
    %cst_7 = arith.constant dense<0.000000e+00> : vector<8x2xf32>
    %5 = tpu.matmul %2, %4, %cst_7 {dimension_numbers = #tpu.dot_dimension_numbers<[1], [0], [0], [1], [0, 0, 1, 1], [], []>} : vector<8x16xf32>, vector<16x2xf32>, vector<8x2xf32> -> vector<8x2xf32>
    %c0_8 = arith.constant 0 : index
    %c0_9 = arith.constant 0 : index
    %6 = vector.load %arg6[%c0_8, %c0_9] : memref<8x2xf32, #tpu.memory_space<vmem>>, vector<8x2xf32>
    tpu.vector_store %arg6[%c0_8, %c0_9], %5 {strides = array<i32>} : memref<8x2xf32, #tpu.memory_space<vmem>>, vector<8x2xf32>,
    %c0_10 = arith.constant 0 : index
    %c0_11 = arith.constant 0 : index
    %7 = vector.load %arg4[%c0_10, %c0_11] : memref<2x16xf32, #tpu.memory_space<vmem>>, vector<2x16xf32>
    %cst_12 = arith.constant dense<0.000000e+00> : vector<2x8xf32>
    %8 = tpu.matmul %7, %2, %cst_12 {dimension_numbers = #tpu.dot_dimension_numbers<[1], [1], [0], [0], [0, 0, 1, 0], [], []>} : vector<2x16xf32>, vector<8x16xf32>, vector<2x8xf32> -> vector<2x8xf32>
    %c0_13 = arith.constant 0 : index
    %c0_14 = arith.constant 0 : index
    %9 = vector.load %arg7[%c0_13, %c0_14] : memref<2x8xf32, #tpu.memory_space<vmem>>, vector<2x8xf32>
    tpu.vector_store %arg7[%c0_13, %c0_14], %8 {strides = array<i32>} : memref<2x8xf32, #tpu.memory_space<vmem>>, vector<2x8xf32>,
    return
  }
  func.func @transform_0(%arg0: i32) -> (i32, i32) {
    %c0_i32 = arith.constant 0 : i32
    %c0_i32_0 = arith.constant 0 : i32
    return %arg0, %c0_i32 : i32, i32
  }
  func.func @transform_1(%arg0: i32) -> (i32, i32) {
    %c0_i32 = arith.constant 0 : i32
    %c0_i32_0 = arith.constant 0 : i32
    %c0_i32_1 = arith.constant 0 : i32
    return %c0_i32, %c0_i32_0 : i32, i32
  }
  func.func @transform_2(%arg0: i32) -> (i32, i32) {
    %c0_i32 = arith.constant 0 : i32
    %c0_i32_0 = arith.constant 0 : i32
    %c0_i32_1 = arith.constant 0 : i32
    return %c0_i32, %c0_i32_0 : i32, i32
  }
  func.func @transform_3(%arg0: i32) -> (i32, i32) {
    %c0_i32 = arith.constant 0 : i32
    %c0_i32_0 = arith.constant 0 : i32
    %c0_i32_1 = arith.constant 0 : i32
    return %c0_i32, %c0_i32_0 : i32, i32
  }
  func.func @transform_4(%arg0: i32) -> (i32, i32) {
    %c0_i32 = arith.constant 0 : i32
    %c0_i32_0 = arith.constant 0 : i32
    return %arg0, %c0_i32 : i32, i32
  }
  func.func @transform_5(%arg0: i32) -> (i32, i32) {
    %c0_i32 = arith.constant 0 : i32
    %c0_i32_0 = arith.constant 0 : i32
    return %arg0, %c0_i32 : i32, i32
  }
  func.func @transform_6(%arg0: i32) -> (i32, i32) {
    %c0_i32 = arith.constant 0 : i32
    %c0_i32_0 = arith.constant 0 : i32
    return %c0_i32, %arg0 : i32, i32
  }
}

module attributes {stable_mosaic.version = 11 : i64} {
  func.func @project_kernel(%arg0: i32, %arg1: memref<8x16xf32, #tpu.memory_space<vmem>>, %arg2: memref<16x16xf32, #tpu.memory_space<vmem>>, %arg3: memref<16x2xf32, #tpu.memory_space<vmem>>, %arg4: memref<2x16xf32, #tpu.memory_space<vmem>>, %arg5: memref<8x16xf32, #tpu.memory_space<vmem>>, %arg6: memref<8x2xf32, #tpu.memory_space<vmem>>, %arg7: memref<2x8xf32, #tpu.memory_space<vmem>>) attributes {dimension_semantics = [#tpu.dimension_semantics<parallel>], iteration_bounds = array<i64: 1>, scalar_prefetch = 0 : i64, scratch_operands = 0 : i64, tpu.core_type = #tpu.core_type<tc>, window_params = [{transform_indices = @transform_0, window_bounds = array<i64: 8, 16>}, {pipeline_mode = #tpu.pipeline_mode<synchronous>, transform_indices = @transform_1, window_bounds = array<i64: 16, 16>}, {pipeline_mode = #tpu.pipeline_mode<synchronous>, transform_indices = @transform_2, window_bounds = array<i64: 16, 2>}, {pipeline_mode = #tpu.pipeline_mode<synchronous>, transform_indices = @transform_3, window_bounds = array<i64: 2, 16>}, {transform_indices = @transform_4, window_bounds = array<i64: 8, 16>}, {transform_indices = @transform_5, window_bounds = array<i64: 8, 2>}, {transform_indices = @transform_6, window_bounds = array<i64: 2, 8>}]} {
    %c0 = arith.constant 0 : index
    %c0_0 = arith.constant 0 : index
    %0 = vector.load %arg1[%c0, %c0_0] : memref<8x16xf32, #tpu.memory_space<vmem>>, vector<8x16xf32>
    %c0_1 = arith.constant 0 : index
    %c0_2 = arith.constant 0 : index
    %1 = vector.load %arg2[%c0_1, %c0_2] : memref<16x16xf32, #tpu.memory_space<vmem>>, vector<16x16xf32>
    %cst = arith.constant dense<0.000000e+00> : vector<8x16xf32>
    %2 = tpu.matmul %0, %1, %cst {dimension_numbers = #tpu.dot_dimension_numbers<[1], [0], [0], [1], [0, 0, 1, 1], [], []>} : vector<8x16xf32>, vector<16x16xf32>, vector<8x16xf32> -> vector<8x16xf32>
    %c0_3 = arith.constant 0 : index
    %c0_4 = arith.constant 0 : index
    %3 = vector.load %arg5[%c0_3, %c0_4] : memref<8x16xf32, #tpu.memory_space<vmem>>, vector<8x16xf32>
    tpu.vector_store %arg5[%c0_3, %c0_4], %2 {strides = array<i32>} : memref<8x16xf32, #tpu.memory_space<vmem>>, vector<8x16xf32>,
    %c0_5 = arith.constant 0 : index
    %c0_6 = arith.constant 0 : index
    %4 = vector.load %arg3[%c0_5, %c0_6] : memref<16x2xf32, #tpu.memory_space<vmem>>, vector<16x2xf32>
    %cst_7 = arith.constant dense<0.000000e+00> : vector<8x2xf32>
    %5 = tpu.matmul %2, %4, %cst_7 {dimension_numbers = #tpu.dot_dimension_numbers<[1], [0], [0], [1], [0, 0, 1, 1], [], []>} : vector<8x16xf32>, vector<16x2xf32>, vector<8x2xf32> -> vector<8x2xf32>
    %c0_8 = arith.constant 0 : index
    %c0_9 = arith.constant 0 : index
    %6 = vector.load %arg6[%c0_8, %c0_9] : memref<8x2xf32, #tpu.memory_space<vmem>>, vector<8x2xf32>
    tpu.vector_store %arg6[%c0_8, %c0_9], %5 {strides = array<i32>} : memref<8x2xf32, #tpu.memory_space<vmem>>, vector<8x2xf32>,
    %c0_10 = arith.constant 0 : index
    %c0_11 = arith.constant 0 : index
    %7 = vector.load %arg4[%c0_10, %c0_11] : memref<2x16xf32, #tpu.memory_space<vmem>>, vector<2x16xf32>
    %cst_12 = arith.constant dense<0.000000e+00> : vector<2x8xf32>
    %8 = tpu.matmul %7, %2, %cst_12 {dimension_numbers = #tpu.dot_dimension_numbers<[1], [1], [0], [0], [0, 0, 1, 0], [], []>} : vector<2x16xf32>, vector<8x16xf32>, vector<2x8xf32> -> vector<2x8xf32>
    %c0_13 = arith.constant 0 : index
    %c0_14 = arith.constant 0 : index
    %9 = vector.load %arg7[%c0_13, %c0_14] : memref<2x8xf32, #tpu.memory_space<vmem>>, vector<2x8xf32>
    tpu.vector_store %arg7[%c0_13, %c0_14], %8 {strides = array<i32>} : memref<2x8xf32, #tpu.memory_space<vmem>>, vector<2x8xf32>,
    return
  }
  func.func @transform_0(%arg0: i32) -> (i32, i32) {
    %c0_i32 = arith.constant 0 : i32
    %c0_i32_0 = arith.constant 0 : i32
    return %arg0, %c0_i32 : i32, i32
  }
  func.func @transform_1(%arg0: i32) -> (i32, i32) {
    %c0_i32 = arith.constant 0 : i32
    %c0_i32_0 = arith.constant 0 : i32
    %c0_i32_1 = arith.constant 0 : i32
    return %c0_i32, %c0_i32_0 : i32, i32
  }
  func.func @transform_2(%arg0: i32) -> (i32, i32) {
    %c0_i32 = arith.constant 0 : i32
    %c0_i32_0 = arith.constant 0 : i32
    %c0_i32_1 = arith.constant 0 : i32
    return %c0_i32, %c0_i32_0 : i32, i32
  }
  func.func @transform_3(%arg0: i32) -> (i32, i32) {
    %c0_i32 = arith.constant 0 : i32
    %c0_i32_0 = arith.constant 0 : i32
    %c0_i32_1 = arith.constant 0 : i32
    return %c0_i32, %c0_i32_0 : i32, i32
  }
  func.func @transform_4(%arg0: i32) -> (i32, i32) {
    %c0_i32 = arith.constant 0 : i32
    %c0_i32_0 = arith.constant 0 : i32
    return %arg0, %c0_i32 : i32, i32
  }
  func.func @transform_5(%arg0: i32) -> (i32, i32) {
    %c0_i32 = arith.constant 0 : i32
    %c0_i32_0 = arith.constant 0 : i32
    return %arg0, %c0_i32 : i32, i32
  }
  func.func @transform_6(%arg0: i32) -> (i32, i32) {
    %c0_i32 = arith.constant 0 : i32
    %c0_i32_0 = arith.constant 0 : i32
    return %c0_i32, %arg0 : i32, i32
  }
}

</mosaic_0001>

<bundles_post_ra>
// kernel: tpu_custom_call.1
= control target key start
LH: loop header
LB: loop body
LE: loop exit
PB: predicated region body
PF: predicated region fallthrough
CT: control target
= control target key end

     0   :  { %12 = vsyncpa [#allocation3], 0  ;;  %s304_s0 = inlined_call_operand.hbm [shape: f32[8,16], index: 0, kind: input, shape index: {}]   ;;  %s305_s1 = inlined_call_operand.vmem [shape: f32[16,16], index: 1, kind: input, shape index: {}]   ;;  %s306_s2 = inlined_call_operand.vmem [shape: f32[16,2], index: 2, kind: input, shape index: {}]   ;;  %s307_s3 = inlined_call_operand.vmem [shape: f32[2,16], index: 3, kind: input, shape index: {}]   ;;  %s308_s4 = inlined_call_operand.hbm [shape: f32[8,16], index: 4, kind: output, shape index: {0}]   ;;  %s309_s5 = inlined_call_operand.vmem [shape: f32[8,2], index: 5, kind: output, shape index: {1}]   ;;  %s310_s6 = inlined_call_operand.hbm [shape: f32[2,8], index: 6, kind: output, shape index: {2}]  }
   0x1   :  { %13 = vsyncpa [#allocation4], 0 }
   0x2   :  { %14 = vsyncpa [#allocation7], 0  ;;  %s20_s23 = sshll.u32 %s304_s0, 4  ;;  %s239_s24 = smov [#allocation2]   ;;  %s21_s23 = int_to_ptr.hbm [resolvable:$true] %s20_s23 }
   0x3   :  { %s22_s25 = sshll.u32 %s239_s24, 4  ;;  %s23_s25 = int_to_ptr.vmem [resolvable:$true] %s22_s25 }
   0x4   :  { %25 = dma.hbm_to_vmem [thread:$0]  %s21_s23, 128, %s23_s25, [#allocation3]  }
   0x5   :  { %233 = dma.done.wait [#allocation3], 128  }
   0x6   :  { %234 = vsyncadd [#allocation3], 4294967168  ;;  %v38_v0 = vld [vmem:[%s305_s1 + $0x8] sm:$0xff]  ;;  %v37_v1 = vld [vmem:[%s305_s1] sm:$0xff]  ;;  %vm39_vm0 = vcmask 130048   ;;  %s240_s10 = smov [#allocation5]  }
   0x7   :  { %57 = vmatpush.msra.mxu0 %v38_v0  ;;  %v36_v2 = vld [vmem:[#allocation2] sm:$0xff]  ;;  %v65_v3 = vld [vmem:[%s306_s2 + $0x8] sm:$0xff]  ;;  %s122_s11 = sshll.u32 %s240_s10, 4  ;;  %s124_s14 = sshll.u32 %s308_s4, 4  ;;  %vm89_vm1 = vcmask 15360   ;;  %vm115_vm2 = vcmask 58368   ;;  %s123_s11 = int_to_ptr.vmem [resolvable:$true] %s122_s11  ;;  %s125_s14 = int_to_ptr.hbm [resolvable:$true] %s124_s14 }
   0x8   :  { %83 = vmatpush.msra.mxu1 %v65_v3  ;;  %v64_v4 = vld [vmem:[%s306_s2] sm:$0xff]  ;;  %s241_s16 = smov [#allocation6]   ;;  %s137_s19 = sshll.u32 %s310_s6, 4  ;;  %s138_s19 = int_to_ptr.hbm [resolvable:$true] %s137_s19 }
   0x9   :  { %58 = vmatpush.msra.mxu0 %v37_v1  ;;  %v91_v6 = vld [vmem:[%s307_s3] sm:$0x3]  ;;  %s135_s17 = sshll.u32 %s241_s16, 4  ;;  %s136_s17 = int_to_ptr.vmem [resolvable:$true] %s135_s17 }
   0xa   :  { %154 = vmatmul.msk.f32.vlgmr.msra.gmra.mxu0 %vm39_vm0, %v36_v2  ;;  %84 = vmatpush.msra.mxu1 %v64_v4 }
  0x87   :  { %v60_v5 = vpop.f32.mrf.mxu0 }
  0x88   :  { %63 = vst.msk [vmem:[#allocation5] sm:$0xff] %vm39_vm0, %v60_v5  ;;  %155 = vmatmul.msk.f32.vlgmr.msra.gmra.mxu1 %vm39_vm0, %v60_v5  ;;  %156 = vmatpush.xpose.msk.msra.mxu2 %vm39_vm0, %v60_v5 }
  0x89   :  { %127 = dma.vmem_to_hbm [thread:$0]  %s123_s11, 128, %s125_s14, [#allocation4]  }
  0x8b   :  { %157 = vmatmul.msk.f32.vlgmr.msra.gmra.mxu2 %vm39_vm0, %v91_v6 }
 0x105   :  { %v86_v7 = vpop.f32.mrf.mxu1 }
 0x106   :  { %90 = vst.msk [vmem:[%s309_s5] sm:$0xff] %vm89_vm1, %v86_v7 }
 0x10e   :  { %v112_v8 = vpop.f32.mrf.mxu2 }
 0x10f   :  { %116 = vst.msk [vmem:[#allocation6] sm:$0x3] %vm115_vm2, %v112_v8 }
 0x110   :  { %140 = dma.vmem_to_hbm [thread:$0]  %s136_s17, 32, %s138_s19, [#allocation7]  }
 0x111   :  { %235 = dma.done.wait [#allocation4], 128  }
 0x112   :  { %236 = vsyncadd [#allocation4], 4294967168 }
 0x113   :  { %237 = dma.done.wait [#allocation7], 32  }
 0x114   :  { %238 = vsyncadd [#allocation7], 4294967264 }
 0x115   :  { %151 = vsyncpa [#allocation3], 1 }
 0x116   :  { %152 = vsyncpa [#allocation4], 1 }
 0x117   :  { %153 = vsyncpa [#allocation7], 1 }

// kernel: tpu_custom_call.1
= control target key start
LH: loop header
LB: loop body
LE: loop exit
PB: predicated region body
PF: predicated region fallthrough
CT: control target
= control target key end

     0   :  { %12 = vsyncpa [#allocation3], 0  ;;  %s304_s0 = inlined_call_operand.hbm [shape: f32[8,16], index: 0, kind: input, shape index: {}]   ;;  %s305_s1 = inlined_call_operand.vmem [shape: f32[16,16], index: 1, kind: input, shape index: {}]   ;;  %s306_s2 = inlined_call_operand.vmem [shape: f32[16,2], index: 2, kind: input, shape index: {}]   ;;  %s307_s3 = inlined_call_operand.vmem [shape: f32[2,16], index: 3, kind: input, shape index: {}]   ;;  %s308_s4 = inlined_call_operand.hbm [shape: f32[8,16], index: 4, kind: output, shape index: {0}]   ;;  %s309_s5 = inlined_call_operand.vmem [shape: f32[8,2], index: 5, kind: output, shape index: {1}]   ;;  %s310_s6 = inlined_call_operand.hbm [shape: f32[2,8], index: 6, kind: output, shape index: {2}]  }
   0x1   :  { %13 = vsyncpa [#allocation4], 0 }
   0x2   :  { %14 = vsyncpa [#allocation7], 0  ;;  %s20_s23 = sshll.u32 %s304_s0, 4  ;;  %s239_s24 = smov [#allocation2]   ;;  %s21_s23 = int_to_ptr.hbm [resolvable:$true] %s20_s23 }
   0x3   :  { %s22_s25 = sshll.u32 %s239_s24, 4  ;;  %s23_s25 = int_to_ptr.vmem [resolvable:$true] %s22_s25 }
   0x4   :  { %25 = dma.hbm_to_vmem [thread:$0]  %s21_s23, 128, %s23_s25, [#allocation3]  }
   0x5   :  { %233 = dma.done.wait [#allocation3], 128  }
   0x6   :  { %234 = vsyncadd [#allocation3], 4294967168  ;;  %v38_v0 = vld [vmem:[%s305_s1 + $0x8] sm:$0xff]  ;;  %v37_v1 = vld [vmem:[%s305_s1] sm:$0xff]  ;;  %vm39_vm0 = vcmask 130048   ;;  %s240_s10 = smov [#allocation5]  }
   0x7   :  { %57 = vmatpush.msra.mxu0 %v38_v0  ;;  %v36_v2 = vld [vmem:[#allocation2] sm:$0xff]  ;;  %v65_v3 = vld [vmem:[%s306_s2 + $0x8] sm:$0xff]  ;;  %s122_s11 = sshll.u32 %s240_s10, 4  ;;  %s124_s14 = sshll.u32 %s308_s4, 4  ;;  %vm89_vm1 = vcmask 15360   ;;  %vm115_vm2 = vcmask 58368   ;;  %s123_s11 = int_to_ptr.vmem [resolvable:$true] %s122_s11  ;;  %s125_s14 = int_to_ptr.hbm [resolvable:$true] %s124_s14 }
   0x8   :  { %83 = vmatpush.msra.mxu1 %v65_v3  ;;  %v64_v4 = vld [vmem:[%s306_s2] sm:$0xff]  ;;  %s241_s16 = smov [#allocation6]   ;;  %s137_s19 = sshll.u32 %s310_s6, 4  ;;  %s138_s19 = int_to_ptr.hbm [resolvable:$true] %s137_s19 }
   0x9   :  { %58 = vmatpush.msra.mxu0 %v37_v1  ;;  %v91_v6 = vld [vmem:[%s307_s3] sm:$0x3]  ;;  %s135_s17 = sshll.u32 %s241_s16, 4  ;;  %s136_s17 = int_to_ptr.vmem [resolvable:$true] %s135_s17 }
   0xa   :  { %154 = vmatmul.msk.f32.vlgmr.msra.gmra.mxu0 %vm39_vm0, %v36_v2  ;;  %84 = vmatpush.msra.mxu1 %v64_v4 }
  0x87   :  { %v60_v5 = vpop.f32.mrf.mxu0 }
  0x88   :  { %63 = vst.msk [vmem:[#allocation5] sm:$0xff] %vm39_vm0, %v60_v5  ;;  %155 = vmatmul.msk.f32.vlgmr.msra.gmra.mxu1 %vm39_vm0, %v60_v5  ;;  %156 = vmatpush.xpose.msk.msra.mxu2 %vm39_vm0, %v60_v5 }
  0x89   :  { %127 = dma.vmem_to_hbm [thread:$0]  %s123_s11, 128, %s125_s14, [#allocation4]  }
  0x8b   :  { %157 = vmatmul.msk.f32.vlgmr.msra.gmra.mxu2 %vm39_vm0, %v91_v6 }
 0x105   :  { %v86_v7 = vpop.f32.mrf.mxu1 }
 0x106   :  { %90 = vst.msk [vmem:[%s309_s5] sm:$0xff] %vm89_vm1, %v86_v7 }
 0x10e   :  { %v112_v8 = vpop.f32.mrf.mxu2 }
 0x10f   :  { %116 = vst.msk [vmem:[#allocation6] sm:$0x3] %vm115_vm2, %v112_v8 }
 0x110   :  { %140 = dma.vmem_to_hbm [thread:$0]  %s136_s17, 32, %s138_s19, [#allocation7]  }
 0x111   :  { %235 = dma.done.wait [#allocation4], 128  }
 0x112   :  { %236 = vsyncadd [#allocation4], 4294967168 }
 0x113   :  { %237 = dma.done.wait [#allocation7], 32  }
 0x114   :  { %238 = vsyncadd [#allocation7], 4294967264 }
 0x115   :  { %151 = vsyncpa [#allocation3], 1 }
 0x116   :  { %152 = vsyncpa [#allocation4], 1 }
 0x117   :  { %153 = vsyncpa [#allocation7], 1 }

</bundles_post_ra>
